<compile_context>
chip_gen: v6e
topology: v6e:2x2x1
jax: 0.10.0
libtpu: 0.0.40
codegen_flags: <defaults>
</compile_context>

<pallas_src>
import functools
import math

import jax
import jax.numpy as jnp
import numpy as np
from jax import lax
from jax.experimental import pallas as pl
from jax.experimental.pallas import tpu as pltpu


def _round_up(v, m):
    return ((v + m - 1) // m) * m


def _sigmoid(v):
    return 1.0 / (1.0 + jnp.exp(-v))


# ----------------------------------------------------------------------------
# Kernel
# ----------------------------------------------------------------------------
def lstm_ad_kernel(x_ref, wih_ref, whh_ref, b_ref, h0_ref, c0_ref,
                   wfc_ref, bfc_ref,
                   out_ref,
                   pre_ref, h_ref, c_ref, hall_ref,
                   *, seq_len, gp):
    """Whole LSTM_AD forward in one invocation (everything fits in VMEM).

    Shapes (kernel-visible, padded):
      x_ref    : (T_pad, F_pad)
      wih_ref  : (F_pad, 4*gp)    gates packed [i | f | g | o], each gp lanes
      whh_ref  : (F_pad, 4*gp)
      b_ref    : (1, 4*gp)        b_ih + b_hh, packed like the gates
      h0_ref   : (8, F_pad)       initial hidden, replicated across sublanes
      c0_ref   : (8, F_pad)       initial cell,  replicated across sublanes
      wfc_ref  : (F_pad, F_pad)
      bfc_ref  : (1, F_pad)
      out_ref  : (T_pad, F_pad)
    """
    # (1) One batched MXU matmul for the input-side gate pre-activations of
    #     every timestep; combined LSTM bias folded in.
    pre_ref[...] = (
        jnp.dot(x_ref[...], wih_ref[...], preferred_element_type=jnp.float32)
        + b_ref[...])

    h_ref[...] = h0_ref[...]
    c_ref[...] = c0_ref[...]
    hall_ref[...] = jnp.zeros_like(hall_ref)

    # (2) The unavoidable sequential recurrence: only h @ W_hh stays in-loop.
    @pl.loop(0, seq_len)
    def _(t):
        rec = jnp.dot(h_ref[...], whh_ref[...],
                      preferred_element_type=jnp.float32)          # (8, 4*gp)
        gates = pre_ref[pl.ds(t, 1), :] + rec                      # (8, 4*gp)
        i = _sigmoid(gates[:, 0 * gp:1 * gp])
        f = _sigmoid(gates[:, 1 * gp:2 * gp])
        g = jnp.tanh(gates[:, 2 * gp:3 * gp])
        o = _sigmoid(gates[:, 3 * gp:4 * gp])
        c_new = f * c_ref[...] + i * g
        h_new = o * jnp.tanh(c_new)
        c_ref[...] = c_new
        h_ref[...] = h_new
        hall_ref[pl.ds(t, 1), :] = h_new[0:1, :]

    # (3) One batched matmul for fcn over all timesteps: 2 * sigmoid(H W + b).
    out_ref[...] = 2.0 * _sigmoid(
        jnp.dot(hall_ref[...], wfc_ref[...], preferred_element_type=jnp.float32)
        + bfc_ref[...])


# ----------------------------------------------------------------------------
# Host-side packing (done once) and wrapper
# ----------------------------------------------------------------------------
def _pad2(a, rows, cols):
    out = jnp.zeros((rows, cols), jnp.float32)
    return out.at[: a.shape[0], : a.shape[1]].set(a.astype(jnp.float32))


def init_lstm_ad_params(key, feats):
    """PyTorch-default init (uniform +-1/sqrt(hidden)) for the output-relevant
    submodules: lstm2 = nn.LSTM(feats, feats), fcn = Linear(feats, feats).
    The dead nn.LSTM(feats, 64) contributes nothing to the output and is
    skipped."""
    ks = jax.random.split(key, 6)
    bound = 1.0 / math.sqrt(feats)
    u = lambda k, shape: jax.random.uniform(k, shape, jnp.float32, -bound, bound)
    return {
        "w_ih": u(ks[0], (4 * feats, feats)),   # PyTorch layout (4F, F), gates i,f,g,o
        "w_hh": u(ks[1], (4 * feats, feats)),
        "b_ih": u(ks[2], (4 * feats,)),
        "b_hh": u(ks[3], (4 * feats,)),
        "w_fc": u(ks[4], (feats, feats)),
        "b_fc": u(ks[5], (feats,)),
    }


def pack_lstm_ad_params(params, feats):
    """One-time packing into kernel layout: transposed to (in, out), zero
    padded, each LSTM gate in its own 128-lane block."""
    f_pad = _round_up(feats, 128)
    gp = f_pad

    def pack_gate_w(w):                                  # (4F, F) torch layout
        blocks = [_pad2(w[k * feats:(k + 1) * feats, :].T, f_pad, gp)
                  for k in range(4)]
        return jnp.concatenate(blocks, axis=1)           # (F_pad, 4*gp)

    def pack_gate_b(b):                                  # (4F,)
        blocks = [_pad2(b[k * feats:(k + 1) * feats].reshape(1, -1), 1, gp)
                  for k in range(4)]
        return jnp.concatenate(blocks, axis=1)           # (1, 4*gp)

    return {
        "wih": pack_gate_w(params["w_ih"]),
        "whh": pack_gate_w(params["w_hh"]),
        "b":   pack_gate_b(params["b_ih"] + params["b_hh"]),
        "wfc": _pad2(params["w_fc"].T, f_pad, f_pad),
        "bfc": _pad2(params["b_fc"].reshape(1, -1), 1, f_pad),
        "f_pad": f_pad,
    }


@functools.partial(jax.jit, static_argnames=())
def lstm_ad_forward(x, packed, h0, c0):
    """x: (seq_len, feats) f32.  Returns (seq_len, feats) = 2*sigmoid(fcn(h_t))."""
    seq_len, feats = x.shape
    f_pad = packed["wfc"].shape[0]
    gp = f_pad
    t_pad = _round_up(seq_len, 8)

    x_p = _pad2(x, t_pad, f_pad)
    h0_p = jnp.broadcast_to(_pad2(h0.reshape(1, -1), 1, f_pad), (8, f_pad))
    c0_p = jnp.broadcast_to(_pad2(c0.reshape(1, -1), 1, f_pad), (8, f_pad))

    vmem = pl.BlockSpec(memory_space=pltpu.MemorySpace.VMEM)
    kern = functools.partial(lstm_ad_kernel, seq_len=seq_len, gp=gp)

    out_p = pl.pallas_call(
        kern,
        out_shape=jax.ShapeDtypeStruct((t_pad, f_pad), jnp.float32),
        in_specs=[vmem] * 8,
        out_specs=vmem,
        scratch_shapes=[
            pltpu.VMEM((t_pad, 4 * gp), jnp.float32),   # pre-activations, all t
            pltpu.VMEM((8, f_pad), jnp.float32),        # h state
            pltpu.VMEM((8, f_pad), jnp.float32),        # c state
            pltpu.VMEM((t_pad, f_pad), jnp.float32),    # all h_t, for batched fcn
        ],
    )(x_p, packed["wih"], packed["whh"], packed["b"], h0_p, c0_p,
      packed["wfc"], packed["bfc"])

    return out_p[:seq_len, :feats]


# ----------------------------------------------------------------------------
# Plain-JAX reference (identical math) for verification
# ----------------------------------------------------------------------------
def lstm_ad_reference(x, params, h0, c0):
    wih, whh = params["w_ih"], params["w_hh"]
    bih, bhh = params["b_ih"], params["b_hh"]
    wfc, bfc = params["w_fc"], params["b_fc"]

    def step(carry, xt):
        h, c = carry
        gates = xt @ wih.T + bih + h @ whh.T + bhh
        i, f, g, o = jnp.split(gates, 4)
        i = _sigmoid(i)
        f = _sigmoid(f)
        g = jnp.tanh(g)
        o = _sigmoid(o)
        c = f * c + i * g
        h = o * jnp.tanh(c)
        y = 2.0 * _sigmoid(h @ wfc.T + bfc)
        return (h, c), y

    (_, _), ys = lax.scan(step, (h0, c0), x)
    return ys


if __name__ == "__main__":
    key = jax.random.PRNGKey(0)
    k_param, k_data, k_h, k_c = jax.random.split(key, 4)

    feats, seq_len = 8, 16
    params = init_lstm_ad_params(k_param, feats)
    x = jax.random.uniform(k_data, (seq_len, feats), jnp.float32)
    # The PyTorch forward draws fresh random initial states per call
    # (torch.rand / torch.randn); modeled with explicit JAX RNG inputs.
    h0 = jax.random.uniform(k_h, (feats,), jnp.float32)
    c0 = jax.random.normal(k_c, (feats,), jnp.float32)

    packed = pack_lstm_ad_params(params, feats)      # one-time weight packing

    out = lstm_ad_forward(x, packed, h0, c0)
    jax.block_until_ready(out)

    out_ref = lstm_ad_reference(x, params, h0, c0)
    assert out.shape == (seq_len, feats)
    np.testing.assert_allclose(np.asarray(out), np.asarray(out_ref),
                               rtol=1e-5, atol=1e-5)

    print("KERNEL_OK")
</pallas_src>

<mosaic_0001>
module attributes {stable_mosaic.version = 11 : i64} {
  func.func @lstm_ad_kernel(%arg0: memref<16x128xf32, #tpu.memory_space<vmem>>, %arg1: memref<128x512xf32, #tpu.memory_space<vmem>>, %arg2: memref<128x512xf32, #tpu.memory_space<vmem>>, %arg3: memref<1x512xf32, #tpu.memory_space<vmem>>, %arg4: memref<8x128xf32, #tpu.memory_space<vmem>>, %arg5: memref<8x128xf32, #tpu.memory_space<vmem>>, %arg6: memref<128x128xf32, #tpu.memory_space<vmem>>, %arg7: memref<1x128xf32, #tpu.memory_space<vmem>>, %arg8: memref<16x128xf32, #tpu.memory_space<vmem>>, %arg9: memref<16x512xf32, #tpu.memory_space<vmem>>, %arg10: memref<8x128xf32, #tpu.memory_space<vmem>>, %arg11: memref<8x128xf32, #tpu.memory_space<vmem>>, %arg12: memref<16x128xf32, #tpu.memory_space<vmem>>) attributes {dimension_semantics = [], scalar_prefetch = 0 : i64, scratch_operands = 4 : i64, tpu.core_type = #tpu.core_type<tc>} {
    %c0 = arith.constant 0 : index
    %c0_0 = arith.constant 0 : index
    %0 = vector.load %arg0[%c0, %c0_0] : memref<16x128xf32, #tpu.memory_space<vmem>>, vector<16x128xf32>
    %c0_1 = arith.constant 0 : index
    %c0_2 = arith.constant 0 : index
    %1 = vector.load %arg1[%c0_1, %c0_2] : memref<128x512xf32, #tpu.memory_space<vmem>>, vector<128x512xf32>
    %cst = arith.constant dense<0.000000e+00> : vector<16x512xf32>
    %2 = tpu.matmul %0, %1, %cst {dimension_numbers = #tpu.dot_dimension_numbers<[1], [0], [0], [1], [0, 0, 1, 1], [], []>} : vector<16x128xf32>, vector<128x512xf32>, vector<16x512xf32> -> vector<16x512xf32>
    %c0_3 = arith.constant 0 : index
    %c0_4 = arith.constant 0 : index
    %3 = vector.load %arg3[%c0_3, %c0_4] : memref<1x512xf32, #tpu.memory_space<vmem>>, vector<1x512xf32>
    %4 = vector.broadcast %3 : vector<1x512xf32> to vector<16x512xf32>
    %5 = arith.addf %2, %4 : vector<16x512xf32>
    %c0_5 = arith.constant 0 : index
    %c0_6 = arith.constant 0 : index
    %6 = vector.load %arg9[%c0_5, %c0_6] : memref<16x512xf32, #tpu.memory_space<vmem>>, vector<16x512xf32>
    tpu.vector_store %arg9[%c0_5, %c0_6], %5 {strides = array<i32>} : memref<16x512xf32, #tpu.memory_space<vmem>>, vector<16x512xf32>,
    %c0_7 = arith.constant 0 : index
    %c0_8 = arith.constant 0 : index
    %7 = vector.load %arg4[%c0_7, %c0_8] : memref<8x128xf32, #tpu.memory_space<vmem>>, vector<8x128xf32>
    %c0_9 = arith.constant 0 : index
    %c0_10 = arith.constant 0 : index
    %8 = vector.load %arg10[%c0_9, %c0_10] : memref<8x128xf32, #tpu.memory_space<vmem>>, vector<8x128xf32>
    tpu.vector_store %arg10[%c0_9, %c0_10], %7 {strides = array<i32>} : memref<8x128xf32, #tpu.memory_space<vmem>>, vector<8x128xf32>,
    %c0_11 = arith.constant 0 : index
    %c0_12 = arith.constant 0 : index
    %9 = vector.load %arg5[%c0_11, %c0_12] : memref<8x128xf32, #tpu.memory_space<vmem>>, vector<8x128xf32>
    %c0_13 = arith.constant 0 : index
    %c0_14 = arith.constant 0 : index
    %10 = vector.load %arg11[%c0_13, %c0_14] : memref<8x128xf32, #tpu.memory_space<vmem>>, vector<8x128xf32>
    tpu.vector_store %arg11[%c0_13, %c0_14], %9 {strides = array<i32>} : memref<8x128xf32, #tpu.memory_space<vmem>>, vector<8x128xf32>,
    %cst_15 = arith.constant 0.000000e+00 : f32
    %11 = vector.broadcast %cst_15 : f32 to vector<16x128xf32>
    %c0_16 = arith.constant 0 : index
    %c0_17 = arith.constant 0 : index
    %12 = vector.load %arg12[%c0_16, %c0_17] : memref<16x128xf32, #tpu.memory_space<vmem>>, vector<16x128xf32>
    tpu.vector_store %arg12[%c0_16, %c0_17], %11 {strides = array<i32>} : memref<16x128xf32, #tpu.memory_space<vmem>>, vector<16x128xf32>,
    %c0_i32 = arith.constant 0 : i32
    %c16_i32 = arith.constant 16 : i32
    %13 = arith.addi %c0_i32, %c16_i32 : i32
    %c1_i32 = arith.constant 1 : i32
    scf.for %arg13 = %c0_i32 to %13 step %c1_i32  : i32 {
      %c1_i32_32 = arith.constant 1 : i32
      %30 = arith.muli %arg13, %c1_i32_32 : i32
      %c0_i32_33 = arith.constant 0 : i32
      %31 = arith.addi %c0_i32_33, %30 : i32
      %c0_34 = arith.constant 0 : index
      %c0_35 = arith.constant 0 : index
      %32 = vector.load %arg10[%c0_34, %c0_35] : memref<8x128xf32, #tpu.memory_space<vmem>>, vector<8x128xf32>
      %c0_36 = arith.constant 0 : index
      %c0_37 = arith.constant 0 : index
      %33 = vector.load %arg2[%c0_36, %c0_37] : memref<128x512xf32, #tpu.memory_space<vmem>>, vector<128x512xf32>
      %cst_38 = arith.constant dense<0.000000e+00> : vector<8x512xf32>
      %34 = tpu.matmul %32, %33, %cst_38 {dimension_numbers = #tpu.dot_dimension_numbers<[1], [0], [0], [1], [0, 0, 1, 1], [], []>} : vector<8x128xf32>, vector<128x512xf32>, vector<8x512xf32> -> vector<8x512xf32>
      %35 = arith.index_cast %31 : i32 to index
      %c0_39 = arith.constant 0 : index
      %36 = vector.load %arg9[%35, %c0_39] : memref<16x512xf32, #tpu.memory_space<vmem>>, vector<1x512xf32>
      %37 = vector.broadcast %36 : vector<1x512xf32> to vector<8x512xf32>
      %38 = arith.addf %37, %34 : vector<8x512xf32>
      %39 = vector.extract_strided_slice %38 {offsets = [0, 0], sizes = [8, 128], strides = [1, 1]} : vector<8x512xf32> to vector<8x128xf32>
      %cst_40 = arith.constant 0.000000e+00 : f32
      %40 = vector.broadcast %cst_40 : f32 to vector<8x128xf32>
      %41 = arith.subf %40, %39 : vector<8x128xf32>
      %42 = math.exp %41 : vector<8x128xf32>
      %cst_41 = arith.constant 1.000000e+00 : f32
      %43 = vector.broadcast %cst_41 : f32 to vector<8x128xf32>
      %44 = arith.addf %43, %42 : vector<8x128xf32>
      %cst_42 = arith.constant 1.000000e+00 : f32
      %45 = vector.broadcast %cst_42 : f32 to vector<8x128xf32>
      %46 = arith.divf %45, %44 : vector<8x128xf32>
      %47 = vector.extract_strided_slice %38 {offsets = [0, 128], sizes = [8, 128], strides = [1, 1]} : vector<8x512xf32> to vector<8x128xf32>
      %cst_43 = arith.constant 0.000000e+00 : f32
      %48 = vector.broadcast %cst_43 : f32 to vector<8x128xf32>
      %49 = arith.subf %48, %47 : vector<8x128xf32>
      %50 = math.exp %49 : vector<8x128xf32>
      %cst_44 = arith.constant 1.000000e+00 : f32
      %51 = vector.broadcast %cst_44 : f32 to vector<8x128xf32>
      %52 = arith.addf %51, %50 : vector<8x128xf32>
      %cst_45 = arith.constant 1.000000e+00 : f32
      %53 = vector.broadcast %cst_45 : f32 to vector<8x128xf32>
      %54 = arith.divf %53, %52 : vector<8x128xf32>
      %55 = vector.extract_strided_slice %38 {offsets = [0, 256], sizes = [8, 128], strides = [1, 1]} : vector<8x512xf32> to vector<8x128xf32>
      %56 = math.tanh %55 : vector<8x128xf32>
      %57 = vector.extract_strided_slice %38 {offsets = [0, 384], sizes = [8, 128], strides = [1, 1]} : vector<8x512xf32> to vector<8x128xf32>
      %cst_46 = arith.constant 0.000000e+00 : f32
      %58 = vector.broadcast %cst_46 : f32 to vector<8x128xf32>
      %59 = arith.subf %58, %57 : vector<8x128xf32>
      %60 = math.exp %59 : vector<8x128xf32>
      %cst_47 = arith.constant 1.000000e+00 : f32
      %61 = vector.broadcast %cst_47 : f32 to vector<8x128xf32>
      %62 = arith.addf %61, %60 : vector<8x128xf32>
      %cst_48 = arith.constant 1.000000e+00 : f32
      %63 = vector.broadcast %cst_48 : f32 to vector<8x128xf32>
      %64 = arith.divf %63, %62 : vector<8x128xf32>
      %c0_49 = arith.constant 0 : index
      %c0_50 = arith.constant 0 : index
      %65 = vector.load %arg11[%c0_49, %c0_50] : memref<8x128xf32, #tpu.memory_space<vmem>>, vector<8x128xf32>
      %66 = arith.mulf %54, %65 : vector<8x128xf32>
      %67 = arith.mulf %46, %56 : vector<8x128xf32>
      %68 = arith.addf %66, %67 : vector<8x128xf32>
      %69 = math.tanh %68 : vector<8x128xf32>
      %70 = arith.mulf %64, %69 : vector<8x128xf32>
      %c0_51 = arith.constant 0 : index
      %c0_52 = arith.constant 0 : index
      %71 = vector.load %arg11[%c0_51, %c0_52] : memref<8x128xf32, #tpu.memory_space<vmem>>, vector<8x128xf32>
      tpu.vector_store %arg11[%c0_51, %c0_52], %68 {strides = array<i32>} : memref<8x128xf32, #tpu.memory_space<vmem>>, vector<8x128xf32>,
      %c0_53 = arith.constant 0 : index
      %c0_54 = arith.constant 0 : index
      %72 = vector.load %arg10[%c0_53, %c0_54] : memref<8x128xf32, #tpu.memory_space<vmem>>, vector<8x128xf32>
      tpu.vector_store %arg10[%c0_53, %c0_54], %70 {strides = array<i32>} : memref<8x128xf32, #tpu.memory_space<vmem>>, vector<8x128xf32>,
      %73 = vector.extract_strided_slice %70 {offsets = [0, 0], sizes = [1, 128], strides = [1, 1]} : vector<8x128xf32> to vector<1x128xf32>
      %74 = arith.index_cast %31 : i32 to index
      %c0_55 = arith.constant 0 : index
      %75 = vector.load %arg12[%74, %c0_55] : memref<16x128xf32, #tpu.memory_space<vmem>>, vector<1x128xf32>
      tpu.vector_store %arg12[%74, %c0_55], %73 {strides = array<i32>} : memref<16x128xf32, #tpu.memory_space<vmem>>, vector<1x128xf32>,
    }
    %c16_i32_18 = arith.constant 16 : i32
    %c0_19 = arith.constant 0 : index
    %c0_20 = arith.constant 0 : index
    %14 = vector.load %arg12[%c0_19, %c0_20] : memref<16x128xf32, #tpu.memory_space<vmem>>, vector<16x128xf32>
    %c0_21 = arith.constant 0 : index
    %c0_22 = arith.constant 0 : index
    %15 = vector.load %arg6[%c0_21, %c0_22] : memref<128x128xf32, #tpu.memory_space<vmem>>, vector<128x128xf32>
    %cst_23 = arith.constant dense<0.000000e+00> : vector<16x128xf32>
    %16 = tpu.matmul %14, %15, %cst_23 {dimension_numbers = #tpu.dot_dimension_numbers<[1], [0], [0], [1], [0, 0, 1, 1], [], []>} : vector<16x128xf32>, vector<128x128xf32>, vector<16x128xf32> -> vector<16x128xf32>
    %c0_24 = arith.constant 0 : index
    %c0_25 = arith.constant 0 : index
    %17 = vector.load %arg7[%c0_24, %c0_25] : memref<1x128xf32, #tpu.memory_space<vmem>>, vector<1x128xf32>
    %18 = vector.broadcast %17 : vector<1x128xf32> to vector<16x128xf32>
    %19 = arith.addf %16, %18 : vector<16x128xf32>
    %cst_26 = arith.constant 0.000000e+00 : f32
    %20 = vector.broadcast %cst_26 : f32 to vector<16x128xf32>
    %21 = arith.subf %20, %19 : vector<16x128xf32>
    %22 = math.exp %21 : vector<16x128xf32>
    %cst_27 = arith.constant 1.000000e+00 : f32
    %23 = vector.broadcast %cst_27 : f32 to vector<16x128xf32>
    %24 = arith.addf %23, %22 : vector<16x128xf32>
    %cst_28 = arith.constant 1.000000e+00 : f32
    %25 = vector.broadcast %cst_28 : f32 to vector<16x128xf32>
    %26 = arith.divf %25, %24 : vector<16x128xf32>
    %cst_29 = arith.constant 2.000000e+00 : f32
    %27 = vector.broadcast %cst_29 : f32 to vector<16x128xf32>
    %28 = arith.mulf %27, %26 : vector<16x128xf32>
    %c0_30 = arith.constant 0 : index
    %c0_31 = arith.constant 0 : index
    %29 = vector.load %arg8[%c0_30, %c0_31] : memref<16x128xf32, #tpu.memory_space<vmem>>, vector<16x128xf32>
    tpu.vector_store %arg8[%c0_30, %c0_31], %28 {strides = array<i32>} : memref<16x128xf32, #tpu.memory_space<vmem>>, vector<16x128xf32>,
    return
  }
}

</mosaic_0001>

<bundles_post_ra>
// kernel: lstm_ad_forward.1
= control target key start
LH: loop header
LB: loop body
LE: loop exit
PB: predicated region body
PF: predicated region fallthrough
CT: control target
= control target key end

     0   :  { %13 = vsyncpa [#allocation7], 0  ;;  %s1068_s0 = inlined_call_operand.vmem [shape: f32[16,128], index: 0, kind: input, shape index: {}]   ;;  %s1069_s1 = inlined_call_operand.hbm [shape: f32[128,512], index: 1, kind: input, shape index: {}]   ;;  %s1070_s2 = inlined_call_operand.hbm [shape: f32[128,512], index: 2, kind: input, shape index: {}]   ;;  %s1071_s3 = inlined_call_operand.hbm [shape: f32[1,512], index: 3, kind: input, shape index: {}]   ;;  %s1072_s4 = inlined_call_operand.vmem [shape: f32[8,128], index: 4, kind: input, shape index: {}]   ;;  %s1073_s5 = inlined_call_operand.vmem [shape: f32[8,128], index: 5, kind: input, shape index: {}]   ;;  %s1074_s6 = inlined_call_operand.vmem [shape: f32[128,128], index: 6, kind: input, shape index: {}]   ;;  %s1075_s7 = inlined_call_operand.vmem [shape: f32[1,128], index: 7, kind: input, shape index: {}]   ;;  %s1076_s8 = inlined_call_operand.vmem [shape: f32[16,128], index: 8, kind: output, shape index: {}]  }
   0x1   :  { %14 = vsyncpa [#allocation9], 0  ;;  %s899_s27 = smov [#allocation8]   ;;  %s900_s29 = smov [#allocation6]  }
   0x2   :  { %s34_s28 = sshll.u32 %s899_s27, 4  ;;  %s22_s30 = sshll.u32 %s900_s29, 4  ;;  %s35_s28 = int_to_ptr.vmem [resolvable:$true] %s34_s28  ;;  %s23_s30 = int_to_ptr.vmem [resolvable:$true] %s22_s30 }
   0x3   :  { %s835_s9 = scalar_lea.vmem %s35_s28, 8192  ;;  %p840_p1 = scmp.lt.s32.totalorder %s35_s28, %s35_s28 }
   0x4   :  { %p836_p0 = scmp.ne.s32.totalorder %s35_s28, %s835_s9  ;;  %p841_p2 = scmp.lt.s32.totalorder %s835_s9, %s835_s9 }
   0x6   :  { %p842_p3 = por %p841_p2, %p840_p1 }
   0x8   :  { %p843_p4 = pnand %p842_p3, %p836_p0 }
   0xa   :  { %846 = shalt.err (!%p843_p4)
}
   0xb   :  { %s901_s10 = smov 512   ;;  %s902_s11 = smov 32  }
   0xc   :  { %40 = dma.hbm_to_vmem [thread:$0]  %s1070_s2, 8192, %s35_s28, [#allocation9], %s901_s10, %s901_s10, %s902_s11  }
   0xd   :  { %s855_s14 = scalar_lea.vmem %s23_s30, 8192  ;;  %p860_p6 = scmp.lt.s32.totalorder %s23_s30, %s23_s30 }
   0xe   :  { %p856_p5 = scmp.ne.s32.totalorder %s23_s30, %s855_s14  ;;  %p861_p7 = scmp.lt.s32.totalorder %s855_s14, %s855_s14 }
  0x10   :  { %p862_p8 = por %p861_p7, %p860_p6 }
  0x12   :  { %p863_p9 = pnand %p862_p8, %p856_p5 }
  0x14   :  { %866 = shalt.err (!%p863_p9)
}
  0x15   :  { %28 = dma.hbm_to_vmem [thread:$0]  %s1069_s1, 8192, %s23_s30, [#allocation7], %s901_s10, %s901_s10, %s902_s11  }
  0x16   :  { %s903_s17 = smov [#allocation10]  }
  0x17   :  { %s47_s18 = sshll.u32 %s903_s17, 4  ;;  %s48_s18 = int_to_ptr.vmem [resolvable:$true] %s47_s18 }
  0x18   :  { %s875_s19 = scalar_lea.vmem %s48_s18, 64  ;;  %p880_p11 = scmp.lt.s32.totalorder %s48_s18, %s48_s18 }
  0x19   :  { %p876_p10 = scmp.ne.s32.totalorder %s48_s18, %s875_s19  ;;  %p881_p12 = scmp.lt.s32.totalorder %s875_s19, %s875_s19 }
  0x1b   :  { %p882_p13 = por %p881_p12, %p880_p11 }
  0x1d   :  { %p883_p0 = pnand %p882_p13, %p876_p10 }
  0x1f   :  { %886 = shalt.err (!%p883_p0)
}
  0x20   :  { %50 = dma.hbm_to_vmem [thread:$0]  %s1071_s3, 64, %s48_s18, [#allocation9]  }
  0x21   :  { %891 = dma.done.wait [#allocation7], 8192  }
  0x22   :  { %892 = vsyncadd [#allocation7], 4294959104 }
  0x23   :  { %893 = dma.done.wait [#allocation9], 8256  }
  0x24   :  { %894 = vsyncadd [#allocation9], 4294959040  ;;  %v904_v0 = vmov 0.0   ;;  %v318_v1 = vld [vmem:[%s1072_s4] sm:$0xff]  ;;  %v131_v3 = vld [vmem:[#allocation6 + $0x1e8] sm:$0xff] }
  0x25   :  { %220 = vmatprep.mubr.f32.mxu0 %v904_v0  ;;  %322 = vst [vmem:[#allocation5] sm:$0xff] %v904_v0  ;;  %323 = vst [vmem:[#allocation5 + $0x8] sm:$0xff] %v904_v0  ;;  %297 = vmatprep.mubr.f32.mxu1 %v904_v0  ;;  %v320_v2 = vld [vmem:[%s1073_s5] sm:$0xff]  ;;  %v133_v4 = vld [vmem:[#allocation6 + $0x1f8] sm:$0xff] }
  0x26   :  { %319 = vst [vmem:[#allocation3] sm:$0xff] %v318_v1  ;;  %321 = vst [vmem:[#allocation4] sm:$0xff] %v320_v2  ;;  %156 = vmatprep.subr.mxu0 %v131_v3  ;;  %v130_v5 = vld [vmem:[#allocation6 + $0x1e0] sm:$0xff]  ;;  %v132_v6 = vld [vmem:[#allocation6 + $0x1f0] sm:$0xff]  ;;  %233 = vmatprep.subr.mxu1 %v133_v4 }
  0x27   :  { %157 = vmatpush1.msra.mxu0 %v130_v5  ;;  %v127_v7 = vld [vmem:[#allocation6 + $0x1c8] sm:$0xff]  ;;  %v129_v8 = vld [vmem:[#allocation6 + $0x1d8] sm:$0xff]  ;;  %v126_v9 = vld [vmem:[#allocation6 + $0x1c0] sm:$0xff]  ;;  %234 = vmatpush1.msra.mxu1 %v132_v6  ;;  %v136_v6 = vlaneseq }
  0x28   :  { %158 = vmatprep.subr.mxu0 %v127_v7  ;;  %v128_v10 = vld [vmem:[#allocation6 + $0x1d0] sm:$0xff]  ;;  %v123_v11 = vld [vmem:[#allocation6 + $0x1a8] sm:$0xff]  ;;  %v125_v12 = vld [vmem:[#allocation6 + $0x1b8] sm:$0xff]  ;;  %235 = vmatprep.subr.mxu1 %v129_v8 }
  0x29   :  { %159 = vmatpush1.msra.mxu0 %v126_v9  ;;  %v122_v13 = vld [vmem:[#allocation6 + $0x1a0] sm:$0xff]  ;;  %v124_v14 = vld [vmem:[#allocation6 + $0x1b0] sm:$0xff]  ;;  %v119_v15 = vld [vmem:[#allocation6 + $0x188] sm:$0xff]  ;;  %236 = vmatpush1.msra.mxu1 %v128_v10  ;;  %v978_v7 = vshrl.u32 %v136_v6, 7 }
  0x2a   :  { %160 = vmatprep.subr.mxu0 %v123_v11  ;;  %v121_v16 = vld [vmem:[#allocation6 + $0x198] sm:$0xff]  ;;  %v118_v17 = vld [vmem:[#allocation6 + $0x180] sm:$0xff]  ;;  %237 = vmatprep.subr.mxu1 %v125_v12  ;;  %v120_v18 = vld [vmem:[#allocation6 + $0x190] sm:$0xff] }
  0x2b   :  { %161 = vmatpush1.msra.mxu0 %v122_v13  ;;  %v115_v19 = vld [vmem:[#allocation6 + $0x168] sm:$0xff]  ;;  %238 = vmatpush1.msra.mxu1 %v124_v14  ;;  %v117_v20 = vld [vmem:[#allocation6 + $0x178] sm:$0xff]  ;;  %v114_v21 = vld [vmem:[#allocation6 + $0x160] sm:$0xff]  ;;  %v138_v8 = vsub.s32 0, %v978_v7  ;;  %v146_v10 = vsub.s32 2, %v978_v7  ;;  %v142_v11 = vsub.s32 1, %v978_v7 }
  0x2c   :  { %162 = vmatprep.subr.mxu0 %v119_v15  ;;  %239 = vmatprep.subr.mxu1 %v121_v16  ;;  %v116_v22 = vld [vmem:[#allocation6 + $0x170] sm:$0xff]  ;;  %v111_v23 = vld [vmem:[#allocation6 + $0x148] sm:$0xff]  ;;  %v113_v24 = vld [vmem:[#allocation6 + $0x158] sm:$0xff]  ;;  %v150_v12 = vsub.s32 3, %v978_v7 }
  0x2d   :  { %163 = vmatpush1.msra.mxu0 %v118_v17  ;;  %240 = vmatpush1.msra.mxu1 %v120_v18  ;;  %v110_v25 = vld [vmem:[#allocation6 + $0x140] sm:$0xff]  ;;  %v112_v26 = vld [vmem:[#allocation6 + $0x150] sm:$0xff]  ;;  %v107_v27 = vld [vmem:[#allocation6 + $0x128] sm:$0xff] }
  0x2e   :  { %164 = vmatprep.subr.mxu0 %v115_v19  ;;  %241 = vmatprep.subr.mxu1 %v117_v20  ;;  %v109_v28 = vld [vmem:[#allocation6 + $0x138] sm:$0xff]  ;;  %v106_v29 = vld [vmem:[#allocation6 + $0x120] sm:$0xff]  ;;  %v108_v30 = vld [vmem:[#allocation6 + $0x130] sm:$0xff] }
  0x2f   :  { %165 = vmatpush1.msra.mxu0 %v114_v21  ;;  %242 = vmatpush1.msra.mxu1 %v116_v22  ;;  %v103_v31 = vld [vmem:[#allocation6 + $0x108] sm:$0xff]  ;;  %v105_v32 = vld [vmem:[#allocation6 + $0x118] sm:$0xff]  ;;  %v102_v33 = vld [vmem:[#allocation6 + $0x100] sm:$0xff] }
  0x30   :  { %166 = vmatprep.subr.mxu0 %v111_v23  ;;  %243 = vmatprep.subr.mxu1 %v113_v24  ;;  %v104_v34 = vld [vmem:[#allocation6 + $0x110] sm:$0xff]  ;;  %v99_v35 = vld [vmem:[#allocation6 + $0xe8] sm:$0xff]  ;;  %v101_v36 = vld [vmem:[#allocation6 + $0xf8] sm:$0xff] }
  0x31   :  { %167 = vmatpush1.msra.mxu0 %v110_v25  ;;  %244 = vmatpush1.msra.mxu1 %v112_v26  ;;  %v98_v37 = vld [vmem:[#allocation6 + $0xe0] sm:$0xff]  ;;  %v100_v38 = vld [vmem:[#allocation6 + $0xf0] sm:$0xff]  ;;  %v95_v39 = vld [vmem:[#allocation6 + $0xc8] sm:$0xff] }
  0x32   :  { %168 = vmatprep.subr.mxu0 %v107_v27  ;;  %245 = vmatprep.subr.mxu1 %v109_v28  ;;  %v97_v40 = vld [vmem:[#allocation6 + $0xd8] sm:$0xff]  ;;  %v94_v41 = vld [vmem:[#allocation6 + $0xc0] sm:$0xff]  ;;  %v96_v42 = vld [vmem:[#allocation6 + $0xd0] sm:$0xff] }
  0x33   :  { %169 = vmatpush1.msra.mxu0 %v106_v29  ;;  %246 = vmatpush1.msra.mxu1 %v108_v30  ;;  %v91_v43 = vld [vmem:[#allocation6 + $0xa8] sm:$0xff]  ;;  %v93_v44 = vld [vmem:[#allocation6 + $0xb8] sm:$0xff]  ;;  %v90_v45 = vld [vmem:[#allocation6 + $0xa0] sm:$0xff] }
  0x34   :  { %170 = vmatprep.subr.mxu0 %v103_v31  ;;  %247 = vmatprep.subr.mxu1 %v105_v32  ;;  %v92_v46 = vld [vmem:[#allocation6 + $0xb0] sm:$0xff]  ;;  %v87_v47 = vld [vmem:[#allocation6 + $0x88] sm:$0xff]  ;;  %v89_v48 = vld [vmem:[#allocation6 + $0x98] sm:$0xff] }
  0x35   :  { %171 = vmatpush1.msra.mxu0 %v102_v33  ;;  %248 = vmatpush1.msra.mxu1 %v104_v34  ;;  %v86_v49 = vld [vmem:[#allocation6 + $0x80] sm:$0xff]  ;;  %v88_v50 = vld [vmem:[#allocation6 + $0x90] sm:$0xff]  ;;  %v83_v51 = vld [vmem:[#allocation6 + $0x68] sm:$0xff] }
  0x36   :  { %172 = vmatprep.subr.mxu0 %v99_v35  ;;  %249 = vmatprep.subr.mxu1 %v101_v36  ;;  %v85_v52 = vld [vmem:[#allocation6 + $0x78] sm:$0xff]  ;;  %v82_v53 = vld [vmem:[#allocation6 + $0x60] sm:$0xff]  ;;  %v84_v54 = vld [vmem:[#allocation6 + $0x70] sm:$0xff] }
  0x37   :  { %173 = vmatpush1.msra.mxu0 %v98_v37  ;;  %250 = vmatpush1.msra.mxu1 %v100_v38  ;;  %v79_v55 = vld [vmem:[#allocation6 + $0x48] sm:$0xff]  ;;  %v81_v56 = vld [vmem:[#allocation6 + $0x58] sm:$0xff]  ;;  %v78_v57 = vld [vmem:[#allocation6 + $0x40] sm:$0xff] }
  0x38   :  { %174 = vmatprep.subr.mxu0 %v95_v39  ;;  %251 = vmatprep.subr.mxu1 %v97_v40  ;;  %v80_v58 = vld [vmem:[#allocation6 + $0x50] sm:$0xff]  ;;  %v75_v59 = vld [vmem:[#allocation6 + $0x28] sm:$0xff]  ;;  %v77_v60 = vld [vmem:[#allocation6 + $0x38] sm:$0xff] }
  0x39   :  { %175 = vmatpush1.msra.mxu0 %v94_v41  ;;  %252 = vmatpush1.msra.mxu1 %v96_v42  ;;  %v74_v61 = vld [vmem:[#allocation6 + $0x20] sm:$0xff]  ;;  %v76_v62 = vld [vmem:[#allocation6 + $0x30] sm:$0xff]  ;;  %v71_v63 = vld [vmem:[#allocation6 + $0x8] sm:$0xff] }
  0x3a   :  { %176 = vmatprep.subr.mxu0 %v91_v43  ;;  %253 = vmatprep.subr.mxu1 %v93_v44  ;;  %v73_v1 = vld [vmem:[#allocation6 + $0x18] sm:$0xff]  ;;  %v70_v2 = vld [vmem:[#allocation6] sm:$0xff]  ;;  %v72_v3 = vld [vmem:[#allocation6 + $0x10] sm:$0xff] }
  0x3b   :  { %177 = vmatpush1.msra.mxu0 %v90_v45  ;;  %254 = vmatpush1.msra.mxu1 %v92_v46  ;;  %v68_v4 = vld [vmem:[%s1068_s0] sm:$0xff]  ;;  %v69_v5 = vld [vmem:[%s1068_s0 + $0x8] sm:$0xff]  ;;  %s992_s0 = smov 0  }
  0x3c   :  { %178 = vmatprep.subr.mxu0 %v87_v47  ;;  %255 = vmatprep.subr.mxu1 %v89_v48  ;;  %v134_v9 = vld [vmem:[#allocation10] sm:$0xf] }
  0x3d   :  { %179 = vmatpush1.msra.mxu0 %v86_v49  ;;  %256 = vmatpush1.msra.mxu1 %v88_v50  ;;  %v139_v13 = vrot.slane %v134_v9, %v138_v8  ;;  %v143_v14 = vrot.slane %v134_v9, %v142_v11  ;;  %v151_v16 = vrot.slane %v134_v9, %v150_v12 }
  0x3e   :  { %180 = vmatprep.subr.mxu0 %v83_v51  ;;  %257 = vmatprep.subr.mxu1 %v85_v52 }
  0x3f   :  { %181 = vmatpush1.msra.mxu0 %v82_v53  ;;  %258 = vmatpush1.msra.mxu1 %v84_v54 }
  0x40   :  { %182 = vmatprep.subr.mxu0 %v79_v55  ;;  %259 = vmatprep.subr.mxu1 %v81_v56 }
  0x41   :  { %183 = vmatpush1.msra.mxu0 %v78_v57  ;;  %260 = vmatpush1.msra.mxu1 %v80_v58 }
  0x42   :  { %184 = vmatprep.subr.mxu0 %v75_v59  ;;  %261 = vmatprep.subr.mxu1 %v77_v60 }
  0x43   :  { %185 = vmatpush1.msra.mxu0 %v74_v61  ;;  %262 = vmatpush1.msra.mxu1 %v76_v62 }
  0x44   :  { %186 = vmatprep.subr.mxu0 %v71_v63  ;;  %263 = vmatprep.subr.mxu1 %v73_v1 }
  0x45   :  { %187 = vmatpush1.msra.mxu0 %v70_v2  ;;  %264 = vmatpush1.msra.mxu1 %v72_v3 }
  0x46   :  { %221 = vmatmul.mubr.f32.vlgmr.msra.gmra.mxu0 %v68_v4  ;;  %298 = vmatmul.mubr.f32.vlgmr.msra.gmra.mxu1 %v68_v4 }
  0x47   :  { %226 = vmatprep.mubr.f32.mxu0 %v904_v0  ;;  %303 = vmatprep.mubr.f32.mxu1 %v904_v0  ;;  %v147_v0 = vrot.slane %v134_v9, %v146_v10 }
  0x4a   :  { %227 = vmatmul.mubr.f32.gmra.mxu0 %v69_v5  ;;  %304 = vmatmul.mubr.f32.gmra.mxu1 %v69_v5 }
 0x106   :  { %v222_v15 = vpop.f32.mrf.mxu0  ;;  %v299_v18 = vpop.f32.mrf.mxu1 }
 0x107   :  { %v223_v17 = vadd.f32 %v222_v15, %v139_v13  ;;  %v300_v19 = vadd.f32 %v299_v18, %v147_v0 }
 0x108   :  { %v224_v20 = vpop.f32.mrf.mxu0  ;;  %v301_v22 = vpop.f32.mrf.mxu1 }
 0x109   :  { %310 = vst [vmem:[#allocation2] sm:$0xff] %v223_v17  ;;  %v225_v21 = vadd.f32 %v224_v20, %v143_v14  ;;  %312 = vst [vmem:[#allocation2 + $0x10] sm:$0xff] %v300_v19  ;;  %v302_v23 = vadd.f32 %v301_v22, %v151_v16 }
 0x10a   :  { %v228_v24 = vpop.f32.mrf.mxu0  ;;  %v305_v26 = vpop.f32.mrf.mxu1 }
 0x10b   :  { %311 = vst [vmem:[#allocation2 + $0x8] sm:$0xff] %v225_v21  ;;  %v229_v25 = vadd.f32 %v228_v24, %v139_v13  ;;  %313 = vst [vmem:[#allocation2 + $0x18] sm:$0xff] %v302_v23  ;;  %v306_v27 = vadd.f32 %v305_v26, %v147_v0 }
 0x10c   :  { %v230_v28 = vpop.f32.mrf.mxu0  ;;  %v307_v30 = vpop.f32.mrf.mxu1 }
 0x10d   :  { %314 = vst [vmem:[#allocation2 + $0x20] sm:$0xff] %v229_v25  ;;  %v231_v29 = vadd.f32 %v230_v28, %v143_v14  ;;  %316 = vst [vmem:[#allocation2 + $0x30] sm:$0xff] %v306_v27  ;;  %v308_v31 = vadd.f32 %v307_v30, %v151_v16 }
 0x10f   :  { %315 = vst [vmem:[#allocation2 + $0x28] sm:$0xff] %v231_v29  ;;  %317 = vst [vmem:[#allocation2 + $0x38] sm:$0xff] %v308_v31 }
 0x110 LB: > { %v392_v32 = vld [vmem:[#allocation8 + $0x1e8] sm:$0xff]  ;;  %v391_v33 = vld [vmem:[#allocation8 + $0x1e0] sm:$0xff]  ;;  %v905_v36 = vmov 0.0   ;;  %v394_v41 = vld [vmem:[#allocation8 + $0x1f8] sm:$0xff]  ;;  %s537_s25 = sshra.s32 %s897_s0, 3  ;;  %s540_s26 = sand.u32 7, %s897_s0  ;;  %s897_s0 = sphi %s992_s0, %s329_s0  }
 0x111   : > { %v388_v34 = vld [vmem:[#allocation8 + $0x1c8] sm:$0xff]  ;;  %395 = vmatprep.subr.mxu0 %v392_v32  ;;  %v387_v35 = vld [vmem:[#allocation8 + $0x1c0] sm:$0xff]  ;;  %459 = vmatprep.mubr.f32.mxu0 %v905_v36  ;;  %v393_v43 = vld [vmem:[#allocation8 + $0x1f0] sm:$0xff]  ;;  %s734_s27 = sshll.u32 %s537_s25, 5  ;;  %s598_s30 = scalar_lea.vmem [#allocation5], %s897_s0 }
 0x112   : > { %396 = vmatpush1.msra.mxu0 %v391_v33  ;;  %v384_v37 = vld [vmem:[#allocation8 + $0x1a8] sm:$0xff]  ;;  %530 = vmatprep.mubr.f32.mxu1 %v905_v36  ;;  %v383_v38 = vld [vmem:[#allocation8 + $0x1a0] sm:$0xff]  ;;  %v390_v45 = vld [vmem:[#allocation8 + $0x1d8] sm:$0xff]  ;;  %s543_s28 = sadd.s32 %s734_s27, %s540_s26  ;;  %s329_s0 = sadd.s32 1, %s897_s0  }
 0x113   : > { %397 = vmatprep.subr.mxu0 %v388_v34  ;;  %v380_v39 = vld [vmem:[#allocation8 + $0x188] sm:$0xff]  ;;  %v379_v40 = vld [vmem:[#allocation8 + $0x180] sm:$0xff]  ;;  %466 = vmatprep.subr.mxu1 %v394_v41  ;;  %v389_v46 = vld [vmem:[#allocation8 + $0x1d0] sm:$0xff]  ;;  %s544_s29 = scalar_lea.vmem [#allocation2], %s543_s28  ;;  %p326_p1 = scmp.ge.s32.totalorder %s329_s0, 16  }
 0x114   : > { %398 = vmatpush1.msra.mxu0 %v387_v35  ;;  %v376_v42 = vld [vmem:[#allocation8 + $0x168] sm:$0xff]  ;;  %v375_v44 = vld [vmem:[#allocation8 + $0x160] sm:$0xff]  ;;  %467 = vmatpush1.msra.mxu1 %v393_v43  ;;  %v386_v48 = vld [vmem:[#allocation8 + $0x1b8] sm:$0xff] }
 0x115   : > { %399 = vmatprep.subr.mxu0 %v384_v37  ;;  %v372_v47 = vld [vmem:[#allocation8 + $0x148] sm:$0xff]  ;;  %468 = vmatprep.subr.mxu1 %v390_v45  ;;  %v371_v49 = vld [vmem:[#allocation8 + $0x140] sm:$0xff]  ;;  %v385_v50 = vld [vmem:[#allocation8 + $0x1b0] sm:$0xff] }
 0x116   : > { %400 = vmatpush1.msra.mxu0 %v383_v38  ;;  %469 = vmatpush1.msra.mxu1 %v389_v46  ;;  %v382_v51 = vld [vmem:[#allocation8 + $0x198] sm:$0xff]  ;;  %v368_v52 = vld [vmem:[#allocation8 + $0x128] sm:$0xff]  ;;  %v381_v53 = vld [vmem:[#allocation8 + $0x190] sm:$0xff] }
 0x117   : > { %401 = vmatprep.subr.mxu0 %v380_v39  ;;  %470 = vmatprep.subr.mxu1 %v386_v48  ;;  %v367_v54 = vld [vmem:[#allocation8 + $0x120] sm:$0xff]  ;;  %v378_v55 = vld [vmem:[#allocation8 + $0x178] sm:$0xff]  ;;  %v364_v56 = vld [vmem:[#allocation8 + $0x108] sm:$0xff] }
 0x118   : > { %402 = vmatpush1.msra.mxu0 %v379_v40  ;;  %471 = vmatpush1.msra.mxu1 %v385_v50  ;;  %v377_v57 = vld [vmem:[#allocation8 + $0x170] sm:$0xff]  ;;  %v363_v58 = vld [vmem:[#allocation8 + $0x100] sm:$0xff]  ;;  %v374_v59 = vld [vmem:[#allocation8 + $0x158] sm:$0xff] }
 0x119   : > { %403 = vmatprep.subr.mxu0 %v376_v42  ;;  %472 = vmatprep.subr.mxu1 %v382_v51  ;;  %v360_v60 = vld [vmem:[#allocation8 + $0xe8] sm:$0xff]  ;;  %v373_v61 = vld [vmem:[#allocation8 + $0x150] sm:$0xff]  ;;  %v359_v62 = vld [vmem:[#allocation8 + $0xe0] sm:$0xff] }
 0x11a   : > { %404 = vmatpush1.msra.mxu0 %v375_v44  ;;  %473 = vmatpush1.msra.mxu1 %v381_v53  ;;  %v370_v63 = vld [vmem:[#allocation8 + $0x138] sm:$0xff]  ;;  %v356_v1 = vld [vmem:[#allocation8 + $0xc8] sm:$0xff]  ;;  %v369_v2 = vld [vmem:[#allocation8 + $0x130] sm:$0xff] }
 0x11b   : > { %405 = vmatprep.subr.mxu0 %v372_v47  ;;  %474 = vmatprep.subr.mxu1 %v378_v55  ;;  %v355_v3 = vld [vmem:[#allocation8 + $0xc0] sm:$0xff]  ;;  %v366_v4 = vld [vmem:[#allocation8 + $0x118] sm:$0xff]  ;;  %v352_v5 = vld [vmem:[#allocation8 + $0xa8] sm:$0xff] }
 0x11c   : > { %406 = vmatpush1.msra.mxu0 %v371_v49  ;;  %475 = vmatpush1.msra.mxu1 %v377_v57  ;;  %v365_v6 = vld [vmem:[#allocation8 + $0x110] sm:$0xff]  ;;  %v351_v9 = vld [vmem:[#allocation8 + $0xa0] sm:$0xff]  ;;  %v362_v13 = vld [vmem:[#allocation8 + $0xf8] sm:$0xff] }
 0x11d   : > { %407 = vmatprep.subr.mxu0 %v368_v52  ;;  %476 = vmatprep.subr.mxu1 %v374_v59  ;;  %v348_v0 = vld [vmem:[#allocation8 + $0x88] sm:$0xff]  ;;  %v361_v14 = vld [vmem:[#allocation8 + $0xf0] sm:$0xff]  ;;  %v347_v15 = vld [vmem:[#allocation8 + $0x80] sm:$0xff] }
 0x11e   : > { %408 = vmatpush1.msra.mxu0 %v367_v54  ;;  %477 = vmatpush1.msra.mxu1 %v373_v61  ;;  %v358_v16 = vld [vmem:[#allocation8 + $0xd8] sm:$0xff]  ;;  %v344_v17 = vld [vmem:[#allocation8 + $0x68] sm:$0xff]  ;;  %v357_v18 = vld [vmem:[#allocation8 + $0xd0] sm:$0xff] }
 0x11f   : > { %409 = vmatprep.subr.mxu0 %v364_v56  ;;  %478 = vmatprep.subr.mxu1 %v370_v63  ;;  %v343_v19 = vld [vmem:[#allocation8 + $0x60] sm:$0xff]  ;;  %v354_v20 = vld [vmem:[#allocation8 + $0xb8] sm:$0xff]  ;;  %v340_v21 = vld [vmem:[#allocation8 + $0x48] sm:$0xff] }
 0x120   : > { %410 = vmatpush1.msra.mxu0 %v363_v58  ;;  %479 = vmatpush1.msra.mxu1 %v369_v2  ;;  %v353_v22 = vld [vmem:[#allocation8 + $0xb0] sm:$0xff]  ;;  %v339_v23 = vld [vmem:[#allocation8 + $0x40] sm:$0xff]  ;;  %v350_v24 = vld [vmem:[#allocation8 + $0x98] sm:$0xff] }
 0x121   : > { %411 = vmatprep.subr.mxu0 %v360_v60  ;;  %480 = vmatprep.subr.mxu1 %v366_v4  ;;  %v336_v25 = vld [vmem:[#allocation8 + $0x28] sm:$0xff]  ;;  %v349_v26 = vld [vmem:[#allocation8 + $0x90] sm:$0xff]  ;;  %v335_v27 = vld [vmem:[#allocation8 + $0x20] sm:$0xff] }
 0x122   : > { %412 = vmatpush1.msra.mxu0 %v359_v62  ;;  %481 = vmatpush1.msra.mxu1 %v365_v6  ;;  %v346_v28 = vld [vmem:[#allocation8 + $0x78] sm:$0xff]  ;;  %v332_v29 = vld [vmem:[#allocation8 + $0x8] sm:$0xff]  ;;  %v345_v30 = vld [vmem:[#allocation8 + $0x70] sm:$0xff] }
 0x123   : > { %413 = vmatprep.subr.mxu0 %v356_v1  ;;  %482 = vmatprep.subr.mxu1 %v362_v13  ;;  %v331_v31 = vld [vmem:[#allocation8] sm:$0xff]  ;;  %v342_v32 = vld [vmem:[#allocation8 + $0x58] sm:$0xff]  ;;  %v341_v34 = vld [vmem:[#allocation8 + $0x50] sm:$0xff] }
 0x124   : > { %414 = vmatpush1.msra.mxu0 %v355_v3  ;;  %483 = vmatpush1.msra.mxu1 %v361_v14  ;;  %v330_v33 = vld [vmem:[#allocation3] sm:$0xff]  ;;  %v338_v35 = vld [vmem:[#allocation8 + $0x38] sm:$0xff]  ;;  %v337_v36 = vld [vmem:[#allocation8 + $0x30] sm:$0xff] }
 0x125   : > { %415 = vmatprep.subr.mxu0 %v352_v5  ;;  %484 = vmatprep.subr.mxu1 %v358_v16  ;;  %v334_v37 = vld [vmem:[#allocation8 + $0x18] sm:$0xff]  ;;  %v333_v38 = vld [vmem:[#allocation8 + $0x10] sm:$0xff]  ;;  %v590_v1 = vld [vmem:[#allocation4] sm:$0xff] }
 0x126   : > { %416 = vmatpush1.msra.mxu0 %v351_v9  ;;  %485 = vmatpush1.msra.mxu1 %v357_v18  ;;  %v545_v39 = vld [vmem:[%s544_s29] ss:$8 sm:$0xf] }
 0x127   : > { %417 = vmatprep.subr.mxu0 %v348_v0  ;;  %486 = vmatprep.subr.mxu1 %v354_v20  ;;  %v550_v40 = vrot.slane %v545_v39, %v138_v8  ;;  %v554_v41 = vrot.slane %v545_v39, %v142_v11  ;;  %v562_v50 = vrot.slane %v545_v39, %v150_v12  ;;  %v616_v16 = vld [vmem:[%s1074_s6 + $0x70] sm:$0xff] (%p326_p1)  ;;  %v614_v18 = vld [vmem:[%s1074_s6 + $0x60] sm:$0xff] (%p326_p1)  ;;  %v613_v8 = vld [vmem:[%s1074_s6 + $0x58] sm:$0xff] (%p326_p1) }
 0x128   : > { %418 = vmatpush1.msra.mxu0 %v347_v15  ;;  %487 = vmatpush1.msra.mxu1 %v353_v22  ;;  %v558_v55 = vrot.slane %v545_v39, %v146_v10  ;;  %v617_v15 = vld [vmem:[%s1074_s6 + $0x78] sm:$0xff] (%p326_p1)  ;;  %v612_v10 = vld [vmem:[%s1074_s6 + $0x50] sm:$0xff] (%p326_p1)  ;;  %v611_v11 = vld [vmem:[%s1074_s6 + $0x48] sm:$0xff] (%p326_p1) }
 0x129   : > { %419 = vmatprep.subr.mxu0 %v344_v17  ;;  %488 = vmatprep.subr.mxu1 %v350_v24  ;;  %v615_v17 = vld [vmem:[%s1074_s6 + $0x68] sm:$0xff] (%p326_p1)  ;;  %v610_v12 = vld [vmem:[%s1074_s6 + $0x40] sm:$0xff] (%p326_p1)  ;;  %v608_v20 = vld [vmem:[%s1074_s6 + $0x30] sm:$0xff] (%p326_p1) }
 0x12a   : > { %420 = vmatpush1.msra.mxu0 %v343_v19  ;;  %489 = vmatpush1.msra.mxu1 %v349_v26  ;;  %v609_v19 = vld [vmem:[%s1074_s6 + $0x38] sm:$0xff] (%p326_p1)  ;;  %v606_v22 = vld [vmem:[%s1074_s6 + $0x20] sm:$0xff] (%p326_p1)  ;;  %v604_v24 = vld [vmem:[%s1074_s6 + $0x10] sm:$0xff] (%p326_p1) }
 0x12b   : > { %421 = vmatprep.subr.mxu0 %v340_v21  ;;  %490 = vmatprep.subr.mxu1 %v346_v28  ;;  %v607_v21 = vld [vmem:[%s1074_s6 + $0x28] sm:$0xff] (%p326_p1)  ;;  %v602_v26 = vld [vmem:[%s1074_s6] sm:$0xff] (%p326_p1) }
 0x12c   : > { %422 = vmatpush1.msra.mxu0 %v339_v23  ;;  %491 = vmatpush1.msra.mxu1 %v345_v30  ;;  %v605_v23 = vld [vmem:[%s1074_s6 + $0x18] sm:$0xff] (%p326_p1)  ;;  %v733_v28 = vld [vmem:[%s1075_s7] ss:$0 sm:$0xff] (%p326_p1) }
 0x12d   : > { %423 = vmatprep.subr.mxu0 %v336_v25  ;;  %492 = vmatprep.subr.mxu1 %v342_v32  ;;  %v603_v25 = vld [vmem:[%s1074_s6 + $0x8] sm:$0xff] (%p326_p1) }
 0x12e   : > { %424 = vmatpush1.msra.mxu0 %v335_v27  ;;  %493 = vmatpush1.msra.mxu1 %v341_v34 }
 0x12f   : > { %425 = vmatprep.subr.mxu0 %v332_v29  ;;  %494 = vmatprep.subr.mxu1 %v338_v35 }
 0x130   : > { %426 = vmatpush1.msra.mxu0 %v331_v31  ;;  %495 = vmatpush1.msra.mxu1 %v337_v36 }
 0x131   : > { %460 = vmatmul.mubr.f32.vlgmr.msra.gmra.mxu0 %v330_v33  ;;  %496 = vmatprep.subr.mxu1 %v334_v37 }
 0x132   : > { %497 = vmatpush1.msra.mxu1 %v333_v38  ;;  %753 = vmatprep.subr.mxu0 (%p326_p1), %v617_v15 }
 0x133   : > { %531 = vmatmul.mubr.f32.vlgmr.msra.gmra.mxu1 %v330_v33  ;;  %754 = vmatpush3.msra.mxu0 (%p326_p1), %v617_v15 }
 0x134   :  { %755 = vmatprep.subr.mxu0 (%p326_p1), %v616_v16 }
 0x135   :  { %756 = vmatpush3.msra.mxu0 (%p326_p1), %v616_v16 }
 0x136   :  { %757 = vmatprep.subr.mxu0 (%p326_p1), %v615_v17 }
 0x137   :  { %758 = vmatpush3.msra.mxu0 (%p326_p1), %v615_v17 }
 0x138   :  { %759 = vmatprep.subr.mxu0 (%p326_p1), %v614_v18 }
 0x139   :  { %760 = vmatpush3.msra.mxu0 (%p326_p1), %v614_v18 }
 0x13a   :  { %761 = vmatprep.subr.mxu0 (%p326_p1), %v613_v8 }
 0x13b   :  { %762 = vmatpush3.msra.mxu0 (%p326_p1), %v613_v8 }
 0x13c   :  { %763 = vmatprep.subr.mxu0 (%p326_p1), %v612_v10 }
 0x13d   :  { %764 = vmatpush3.msra.mxu0 (%p326_p1), %v612_v10 }
 0x13e   :  { %765 = vmatprep.subr.mxu0 (%p326_p1), %v611_v11 }
 0x13f   :  { %766 = vmatpush3.msra.mxu0 (%p326_p1), %v611_v11 }
 0x140   :  { %767 = vmatprep.subr.mxu0 (%p326_p1), %v610_v12 }
 0x141   :  { %768 = vmatpush3.msra.mxu0 (%p326_p1), %v610_v12 }
 0x142   :  { %769 = vmatprep.subr.mxu0 (%p326_p1), %v609_v19 }
 0x143   :  { %770 = vmatpush3.msra.mxu0 (%p326_p1), %v609_v19 }
 0x144   :  { %771 = vmatprep.subr.mxu0 (%p326_p1), %v608_v20 }
 0x145   :  { %772 = vmatpush3.msra.mxu0 (%p326_p1), %v608_v20 }
 0x146   :  { %773 = vmatprep.subr.mxu0 (%p326_p1), %v607_v21 }
 0x147   :  { %774 = vmatpush3.msra.mxu0 (%p326_p1), %v607_v21 }
 0x148   :  { %775 = vmatprep.subr.mxu0 (%p326_p1), %v606_v22 }
 0x149   :  { %776 = vmatpush3.msra.mxu0 (%p326_p1), %v606_v22 }
 0x14a   :  { %777 = vmatprep.subr.mxu0 (%p326_p1), %v605_v23 }
 0x14b   :  { %778 = vmatpush3.msra.mxu0 (%p326_p1), %v605_v23 }
 0x14c   :  { %779 = vmatprep.subr.mxu0 (%p326_p1), %v604_v24 }
 0x14d   :  { %780 = vmatpush3.msra.mxu0 (%p326_p1), %v604_v24 }
 0x14e   :  { %781 = vmatprep.subr.mxu0 (%p326_p1), %v603_v25 }
 0x14f   :  { %782 = vmatpush3.msra.mxu0 (%p326_p1), %v603_v25 }
 0x150   :  { %783 = vmatprep.subr.mxu0 (%p326_p1), %v602_v26 }
 0x151   :  { %784 = vmatpush3.msra.mxu0 (%p326_p1), %v602_v26 }
 0x1f1   : > { %v461_v42 = vpop.f32.mrf.mxu0 }
 0x1f2   : > { %v567_v43 = vadd.f32 %v550_v40, %v461_v42 }
 0x1f3   : > { %v463_v44 = vpop.f32.mrf.mxu0  ;;  %v532_v49 = vpop.f32.mrf.mxu1 }
 0x1f4   : > { %v571_v45 = vsub.f32 0.0, %v567_v43  ;;  %v568_v46 = vadd.f32 %v554_v41, %v463_v44  ;;  %v569_v58 = vadd.f32 %v558_v55, %v532_v49 }
 0x1f5   : > { %v534_v52 = vpop.f32.mrf.mxu1 }
 0x1f6   : > { %v572_v47 = vmul.f32 1.442695, %v571_v45  ;;  %v577_v48 = vsub.f32 0.0, %v568_v46  ;;  %v570_v53 = vadd.f32 %v562_v50, %v534_v52 }
 0x1f8   : > { %803 = vpow2.f32 %v572_v47  ;;  %v578_v51 = vmul.f32 1.442695, %v577_v48  ;;  %v584_v54 = vsub.f32 0.0, %v570_v53 }
 0x1fa   : > { %805 = vpow2.f32 %v578_v51  ;;  %v585_v56 = vmul.f32 1.442695, %v584_v54 }
 0x1fc   : > { %807 = vpow2.f32 %v585_v56 }
 0x205   : > { %v804_v57 = vpop.eup %803 }
 0x206   : > { %v574_v59 = vadd.f32 1.0, %v804_v57 }
 0x207   : > { %v806_v60 = vpop.eup %805 }
 0x208   : > { %809 = vrcp.f32 %v574_v59  ;;  %v580_v61 = vadd.f32 1.0, %v806_v60 }
 0x209   : > { %811 = vtanh.f32 %v569_v58  ;;  %v808_v62 = vpop.eup %807 }
 0x20a   : > { %813 = vrcp.f32 %v580_v61  ;;  %v587_v4 = vadd.f32 1.0, %v808_v62 }
 0x20c   : > { %815 = vrcp.f32 %v587_v4 }
 0x215   : > { %v810_v63 = vpop.eup %809 }
 0x216   : > { %v812_v2 = vpop.eup %811 }
 0x217   : > { %v814_v3 = vpop.eup %813  ;;  %v592_v6 = vmul.f32 %v812_v2, %v810_v63 }
 0x218   : > { %v591_v5 = vmul.f32 %v814_v3, %v590_v1 }
 0x219   : > { %v816_v13 = vpop.eup %815 }
 0x21a   : > { %v593_v9 = vadd.f32 %v592_v6, %v591_v5 }
 0x21c   : > { %817 = vtanh.f32 %v593_v9  ;;  %596 = vst [vmem:[#allocation4] sm:$0xff] %v593_v9 }
 0x228   :  { %328 = sbr.rel (!%p326_p1) target bundleno = 272 (0x110), region = 73 }
 0x229   : > { %v818_v0 = vpop.eup %817 }
 0x22a   : > { %v595_v14 = vmul.f32 %v818_v0, %v816_v13 }
 0x22c   : > { %597 = vst [vmem:[#allocation3] sm:$0xff] %v595_v14  ;;  %599 = vst [vmem:[%s598_s30] sm:$0x1] %v595_v14 }
 0x233   :  { %v600_v7 = vld [vmem:[#allocation5] sm:$0xff]  ;;  %v601_v27 = vld [vmem:[#allocation5 + $0x8] sm:$0xff] }
 0x234   :  { %785 = vmatprep.mubr.f32.mxu0 %v600_v7 }
 0x235   :  { %786 = vmatmul.mubr.f32.vlgmr.msra.gmra.mxu0 %v601_v27 }
 0x2f5   :  { %v787_v29 = vpop.f32.mrf.mxu0 }
 0x2f6   :  { %v697_v30 = vadd.f32 %v787_v29, %v733_v28 }
 0x2f7   :  { %v691_v31 = vpop.f32.mrf.mxu0 }
 0x2f8   :  { %v701_v32 = vsub.f32 0.0, %v697_v30  ;;  %v692_v33 = vadd.f32 %v733_v28, %v691_v31 }
 0x2fa   :  { %v704_v34 = vmul.f32 1.442695, %v701_v32  ;;  %v700_v35 = vsub.f32 0.0, %v692_v33 }
 0x2fc   :  { %819 = vpow2.f32 %v704_v34  ;;  %v702_v36 = vmul.f32 1.442695, %v700_v35 }
 0x2fe   :  { %821 = vpow2.f32 %v702_v36 }
 0x309   :  { %v820_v37 = vpop.eup %819 }
 0x30a   :  { %v707_v38 = vadd.f32 1.0, %v820_v37 }
 0x30b   :  { %v822_v39 = vpop.eup %821 }
 0x30c   :  { %823 = vrcp.f32 %v707_v38  ;;  %v706_v40 = vadd.f32 1.0, %v822_v39 }
 0x30e   :  { %825 = vrcp.f32 %v706_v40 }
 0x319   :  { %v824_v41 = vpop.eup %823 }
 0x31a   :  { %v713_v42 = vmul.f32 2.0, %v824_v41 }
 0x31b   :  { %v826_v43 = vpop.eup %825 }
 0x31c   :  { %715 = vst [vmem:[%s1076_s8 + $0x8] sm:$0xff] %v713_v42  ;;  %v712_v44 = vmul.f32 2.0, %v826_v43 }
 0x31e   :  { %714 = vst [vmem:[%s1076_s8] sm:$0xff] %v712_v44 }
 0x31f   :  { %720 = vsyncpa [#allocation7], 1 }
 0x320   :  { %721 = vsyncpa [#allocation9], 1 }

</bundles_post_ra>
